<compile_context>
chip_gen: v5e
topology: v5e:2x2
jax: 0.10.0
libtpu: 0.0.40
codegen_flags: <defaults>
</compile_context>

<pallas_src>
import jax
import jax.numpy as jnp
from jax.experimental import pallas as pl
from jax.experimental.pallas import tpu as pltpu


# ------------------------------ fused kernel ---------------------------------

def _fused_bnn_kernel(x_ref, *refs):
    """refs = ([w_mu, w_sigma, b_mu, b_sigma, eps_w, eps_b] * L, o_ref).

    Runs ONE Monte-Carlo sample (current grid step) of the full
    BayesLinear+ReLU stack; intermediate activations never leave VMEM/vregs.
    """
    o_ref = refs[-1]
    layer_refs = refs[:-1]
    n_layers = len(layer_refs) // 6

    h = x_ref[...]                                              # (B, In_0) f32
    for l in range(n_layers):                                   # unrolled at trace time
        w_mu, w_sigma, b_mu, b_sigma, eps_w, eps_b = layer_refs[6 * l:6 * l + 6]

        # Reparameterized weight / bias for this MC sample.
        w = w_mu[...] + w_sigma[...] * eps_w[0]                  # (In_l, Out_l)
        b = b_mu[...] + b_sigma[...] * eps_b[0]                  # (1,  Out_l)

        # Linear + bias + ReLU (MXU matmul, f32 accumulation).
        h = jnp.dot(h, w, preferred_element_type=jnp.float32) + b
        h = jnp.maximum(h, 0.0)

    o_ref[0] = h.astype(o_ref.dtype)                             # write this sample's slot


# ------------------------------- wrappers ------------------------------------

def sample_eps(key, params, num_samples):
    """Draw eps ~ N(0,1) for every weight/bias, for `num_samples` MC samples."""
    eps = []
    for (w_mu, _, b_mu, _) in params:
        key, kw, kb = jax.random.split(key, 3)
        eps.append((
            jax.random.normal(kw, (num_samples,) + w_mu.shape, jnp.float32),
            jax.random.normal(kb, (num_samples,) + b_mu.shape, jnp.float32),
        ))
    return eps


def bnn_forward(x, params, eps):
    """Fused BNN forward for S Monte-Carlo samples in a single pallas_call.

    x:      (B, In_0) f32
    params: list of (w_mu, w_sigma, b_mu, b_sigma); w_* in (In, Out) layout,
            b_* in (1, Out) layout, sigma already exponentiated.
    eps:    list of (eps_w, eps_b) with shapes (S, In, Out) / (S, 1, Out).
    Returns (S, B, Out_last) f32.
    """
    B = x.shape[0]
    out_dim = params[-1][0].shape[1]
    num_samples = eps[0][0].shape[0]

    inputs = [x]
    # x: full-array block, constant index -> VMEM-resident across the grid.
    in_specs = [pl.BlockSpec(x.shape, lambda s: (0, 0))]
    for (w_mu, w_sigma, b_mu, b_sigma), (eps_w, eps_b) in zip(params, eps):
        In, Out = w_mu.shape
        inputs += [w_mu, w_sigma, b_mu, b_sigma, eps_w, eps_b]
        in_specs += [
            # Parameters: constant block index -> DMA'd once, resident for all S samples.
            pl.BlockSpec((In, Out), lambda s: (0, 0)),
            pl.BlockSpec((In, Out), lambda s: (0, 0)),
            pl.BlockSpec((1, Out), lambda s: (0, 0)),
            pl.BlockSpec((1, Out), lambda s: (0, 0)),
            # Per-sample noise: one slab streamed (and pipelined) per grid step.
            pl.BlockSpec((1, In, Out), lambda s: (s, 0, 0)),
            pl.BlockSpec((1, 1, Out), lambda s: (s, 0, 0)),
        ]

    return pl.pallas_call(
        _fused_bnn_kernel,
        out_shape=jax.ShapeDtypeStruct((num_samples, B, out_dim), jnp.float32),
        grid=(num_samples,),
        in_specs=in_specs,
        out_specs=pl.BlockSpec((1, B, out_dim), lambda s: (s, 0, 0)),
        # Independent MC samples -> shard the grid axis across TensorCores (v7x).
        compiler_params=pltpu.CompilerParams(dimension_semantics=("parallel",)),
    )(*inputs)


def init_bnn_params(key, state_stack, input_dim, architecture=(256, 128, 64),
                    prior_sigma=0.1):
    """torchbnn-style BayesLinear init, stored directly in kernel layout.

    Weights kept as (In, Out) so the kernel computes x @ W with no per-forward
    transpose; sigma = exp(log_sigma) pre-computed once (= prior_sigma at init).
    """
    dims = [state_stack * input_dim] + list(architecture)
    params = []
    for i in range(len(dims) - 1):
        In, Out = dims[i], dims[i + 1]
        key, k1, k2 = jax.random.split(key, 3)
        stdv = 1.0 / float(In) ** 0.5
        w_mu = jax.random.uniform(k1, (In, Out), jnp.float32, -stdv, stdv)
        b_mu = jax.random.uniform(k2, (1, Out), jnp.float32, -stdv, stdv)
        w_sigma = jnp.full((In, Out), prior_sigma, jnp.float32)
        b_sigma = jnp.full((1, Out), prior_sigma, jnp.float32)
        params.append((w_mu, w_sigma, b_mu, b_sigma))
    return params


def bnn_forward_ref(x, params, eps):
    """Pure-jnp reference of the stochastic reparameterized forward."""
    outs = []
    num_samples = eps[0][0].shape[0]
    for s in range(num_samples):
        h = x
        for (w_mu, w_sigma, b_mu, b_sigma), (eps_w, eps_b) in zip(params, eps):
            w = w_mu + w_sigma * eps_w[s]
            b = b_mu + b_sigma * eps_b[s]
            h = jnp.maximum(h @ w + b, 0.0)
        outs.append(h)
    return jnp.stack(outs)


if __name__ == "__main__":
    # Shapes consistent with the module: state_stack=2, input_dim=16
    # -> in_features = 32, architecture = [256, 128, 64]; batch = 8.
    state_stack, input_dim = 2, 16
    architecture = (256, 128, 64)
    batch = 8
    num_samples = 4            # several MC forwards amortized in one pallas_call

    key = jax.random.PRNGKey(0)
    key, pkey, xkey, ekey = jax.random.split(key, 4)
    params = init_bnn_params(pkey, state_stack, input_dim, architecture)
    x = jax.random.normal(xkey, (batch, state_stack * input_dim), jnp.float32)
    eps = sample_eps(ekey, params, num_samples)

    # 1) Stochastic forward (S Monte-Carlo samples in one fused kernel call).
    out = jax.block_until_ready(bnn_forward(x, params, eps))
    assert out.shape == (num_samples, batch, architecture[-1])
    assert bool(jnp.all(jnp.isfinite(out)))

    # 2) Exact correctness of the stochastic path: same eps -> must match the
    #    pure-jnp reparameterized reference per sample.
    ref = bnn_forward_ref(x, params, eps)
    assert jnp.allclose(out, ref, atol=1e-4, rtol=1e-5), \
        "mismatch vs reparameterized reference"

    # 3) Deterministic sanity: with sigma = 0 the sampled weights collapse to
    #    their means regardless of eps.
    params_mean = [(w_mu, jnp.zeros_like(ws), b_mu, jnp.zeros_like(bs))
                   for (w_mu, ws, b_mu, bs) in params]
    out_mean = jax.block_until_ready(bnn_forward(x, params_mean, eps))
    h = x
    for (w_mu, _, b_mu, _) in params:
        h = jnp.maximum(h @ w_mu + b_mu, 0.0)
    assert jnp.allclose(out_mean[0], h, atol=1e-4, rtol=1e-5), \
        "mismatch vs deterministic (sigma=0) reference"

    print("KERNEL_OK")
</pallas_src>

<mosaic_0001>
module attributes {stable_mosaic.version = 11 : i64} {
  func.func @_fused_bnn_kernel(%arg0: i32, %arg1: memref<8x32xf32, #tpu.memory_space<vmem>>, %arg2: memref<32x256xf32, #tpu.memory_space<vmem>>, %arg3: memref<32x256xf32, #tpu.memory_space<vmem>>, %arg4: memref<1x256xf32, #tpu.memory_space<vmem>>, %arg5: memref<1x256xf32, #tpu.memory_space<vmem>>, %arg6: memref<1x32x256xf32, #tpu.memory_space<vmem>>, %arg7: memref<1x1x256xf32, #tpu.memory_space<vmem>>, %arg8: memref<256x128xf32, #tpu.memory_space<vmem>>, %arg9: memref<256x128xf32, #tpu.memory_space<vmem>>, %arg10: memref<1x128xf32, #tpu.memory_space<vmem>>, %arg11: memref<1x128xf32, #tpu.memory_space<vmem>>, %arg12: memref<1x256x128xf32, #tpu.memory_space<vmem>>, %arg13: memref<1x1x128xf32, #tpu.memory_space<vmem>>, %arg14: memref<128x64xf32, #tpu.memory_space<vmem>>, %arg15: memref<128x64xf32, #tpu.memory_space<vmem>>, %arg16: memref<1x64xf32, #tpu.memory_space<vmem>>, %arg17: memref<1x64xf32, #tpu.memory_space<vmem>>, %arg18: memref<1x128x64xf32, #tpu.memory_space<vmem>>, %arg19: memref<1x1x64xf32, #tpu.memory_space<vmem>>, %arg20: memref<1x8x64xf32, #tpu.memory_space<vmem>>) attributes {dimension_semantics = [#tpu.dimension_semantics<parallel>], iteration_bounds = array<i64: 4>, scalar_prefetch = 0 : i64, scratch_operands = 0 : i64, tpu.core_type = #tpu.core_type<tc>, window_params = [{pipeline_mode = #tpu.pipeline_mode<synchronous>, transform_indices = @transform_0, window_bounds = array<i64: 8, 32>}, {pipeline_mode = #tpu.pipeline_mode<synchronous>, transform_indices = @transform_1, window_bounds = array<i64: 32, 256>}, {pipeline_mode = #tpu.pipeline_mode<synchronous>, transform_indices = @transform_2, window_bounds = array<i64: 32, 256>}, {pipeline_mode = #tpu.pipeline_mode<synchronous>, transform_indices = @transform_3, window_bounds = array<i64: 1, 256>}, {pipeline_mode = #tpu.pipeline_mode<synchronous>, transform_indices = @transform_4, window_bounds = array<i64: 1, 256>}, {transform_indices = @transform_5, window_bounds = array<i64: 1, 32, 256>}, {transform_indices = @transform_6, window_bounds = array<i64: 1, 1, 256>}, {pipeline_mode = #tpu.pipeline_mode<synchronous>, transform_indices = @transform_7, window_bounds = array<i64: 256, 128>}, {pipeline_mode = #tpu.pipeline_mode<synchronous>, transform_indices = @transform_8, window_bounds = array<i64: 256, 128>}, {pipeline_mode = #tpu.pipeline_mode<synchronous>, transform_indices = @transform_9, window_bounds = array<i64: 1, 128>}, {pipeline_mode = #tpu.pipeline_mode<synchronous>, transform_indices = @transform_10, window_bounds = array<i64: 1, 128>}, {transform_indices = @transform_11, window_bounds = array<i64: 1, 256, 128>}, {transform_indices = @transform_12, window_bounds = array<i64: 1, 1, 128>}, {pipeline_mode = #tpu.pipeline_mode<synchronous>, transform_indices = @transform_13, window_bounds = array<i64: 128, 64>}, {pipeline_mode = #tpu.pipeline_mode<synchronous>, transform_indices = @transform_14, window_bounds = array<i64: 128, 64>}, {pipeline_mode = #tpu.pipeline_mode<synchronous>, transform_indices = @transform_15, window_bounds = array<i64: 1, 64>}, {pipeline_mode = #tpu.pipeline_mode<synchronous>, transform_indices = @transform_16, window_bounds = array<i64: 1, 64>}, {transform_indices = @transform_17, window_bounds = array<i64: 1, 128, 64>}, {transform_indices = @transform_18, window_bounds = array<i64: 1, 1, 64>}, {transform_indices = @transform_19, window_bounds = array<i64: 1, 8, 64>}]} {
    %c0 = arith.constant 0 : index
    %c0_0 = arith.constant 0 : index
    %0 = vector.load %arg1[%c0, %c0_0] : memref<8x32xf32, #tpu.memory_space<vmem>>, vector<8x32xf32>
    %c0_1 = arith.constant 0 : index
    %c0_2 = arith.constant 0 : index
    %1 = vector.load %arg2[%c0_1, %c0_2] : memref<32x256xf32, #tpu.memory_space<vmem>>, vector<32x256xf32>
    %c0_3 = arith.constant 0 : index
    %c0_4 = arith.constant 0 : index
    %2 = vector.load %arg3[%c0_3, %c0_4] : memref<32x256xf32, #tpu.memory_space<vmem>>, vector<32x256xf32>
    %c0_5 = arith.constant 0 : index
    %c0_6 = arith.constant 0 : index
    %c0_7 = arith.constant 0 : index
    %3 = vector.load %arg6[%c0_5, %c0_6, %c0_7] : memref<1x32x256xf32, #tpu.memory_space<vmem>>, vector<1x32x256xf32>
    %4 = vector.shape_cast %3 : vector<1x32x256xf32> to vector<32x256xf32>
    %5 = arith.mulf %2, %4 : vector<32x256xf32>
    %6 = arith.addf %1, %5 : vector<32x256xf32>
    %c0_8 = arith.constant 0 : index
    %c0_9 = arith.constant 0 : index
    %7 = vector.load %arg4[%c0_8, %c0_9] : memref<1x256xf32, #tpu.memory_space<vmem>>, vector<1x256xf32>
    %c0_10 = arith.constant 0 : index
    %c0_11 = arith.constant 0 : index
    %8 = vector.load %arg5[%c0_10, %c0_11] : memref<1x256xf32, #tpu.memory_space<vmem>>, vector<1x256xf32>
    %c0_12 = arith.constant 0 : index
    %c0_13 = arith.constant 0 : index
    %c0_14 = arith.constant 0 : index
    %9 = vector.load %arg7[%c0_12, %c0_13, %c0_14] : memref<1x1x256xf32, #tpu.memory_space<vmem>>, vector<1x1x256xf32>
    %10 = vector.shape_cast %9 : vector<1x1x256xf32> to vector<1x256xf32>
    %11 = arith.mulf %8, %10 : vector<1x256xf32>
    %12 = arith.addf %7, %11 : vector<1x256xf32>
    %cst = arith.constant dense<0.000000e+00> : vector<8x256xf32>
    %13 = tpu.matmul %0, %6, %cst {dimension_numbers = #tpu.dot_dimension_numbers<[1], [0], [0], [1], [0, 0, 1, 1], [], []>} : vector<8x32xf32>, vector<32x256xf32>, vector<8x256xf32> -> vector<8x256xf32>
    %14 = vector.broadcast %12 : vector<1x256xf32> to vector<8x256xf32>
    %15 = arith.addf %13, %14 : vector<8x256xf32>
    %cst_15 = arith.constant 0.000000e+00 : f32
    %16 = vector.broadcast %cst_15 : f32 to vector<8x256xf32>
    %17 = arith.maximumf %15, %16 : vector<8x256xf32>
    %c0_16 = arith.constant 0 : index
    %c0_17 = arith.constant 0 : index
    %18 = vector.load %arg8[%c0_16, %c0_17] : memref<256x128xf32, #tpu.memory_space<vmem>>, vector<256x128xf32>
    %c0_18 = arith.constant 0 : index
    %c0_19 = arith.constant 0 : index
    %19 = vector.load %arg9[%c0_18, %c0_19] : memref<256x128xf32, #tpu.memory_space<vmem>>, vector<256x128xf32>
    %c0_20 = arith.constant 0 : index
    %c0_21 = arith.constant 0 : index
    %c0_22 = arith.constant 0 : index
    %20 = vector.load %arg12[%c0_20, %c0_21, %c0_22] : memref<1x256x128xf32, #tpu.memory_space<vmem>>, vector<1x256x128xf32>
    %21 = vector.shape_cast %20 : vector<1x256x128xf32> to vector<256x128xf32>
    %22 = arith.mulf %19, %21 : vector<256x128xf32>
    %23 = arith.addf %18, %22 : vector<256x128xf32>
    %c0_23 = arith.constant 0 : index
    %c0_24 = arith.constant 0 : index
    %24 = vector.load %arg10[%c0_23, %c0_24] : memref<1x128xf32, #tpu.memory_space<vmem>>, vector<1x128xf32>
    %c0_25 = arith.constant 0 : index
    %c0_26 = arith.constant 0 : index
    %25 = vector.load %arg11[%c0_25, %c0_26] : memref<1x128xf32, #tpu.memory_space<vmem>>, vector<1x128xf32>
    %c0_27 = arith.constant 0 : index
    %c0_28 = arith.constant 0 : index
    %c0_29 = arith.constant 0 : index
    %26 = vector.load %arg13[%c0_27, %c0_28, %c0_29] : memref<1x1x128xf32, #tpu.memory_space<vmem>>, vector<1x1x128xf32>
    %27 = vector.shape_cast %26 : vector<1x1x128xf32> to vector<1x128xf32>
    %28 = arith.mulf %25, %27 : vector<1x128xf32>
    %29 = arith.addf %24, %28 : vector<1x128xf32>
    %cst_30 = arith.constant dense<0.000000e+00> : vector<8x128xf32>
    %30 = tpu.matmul %17, %23, %cst_30 {dimension_numbers = #tpu.dot_dimension_numbers<[1], [0], [0], [1], [0, 0, 1, 1], [], []>} : vector<8x256xf32>, vector<256x128xf32>, vector<8x128xf32> -> vector<8x128xf32>
    %31 = vector.broadcast %29 : vector<1x128xf32> to vector<8x128xf32>
    %32 = arith.addf %30, %31 : vector<8x128xf32>
    %cst_31 = arith.constant 0.000000e+00 : f32
    %33 = vector.broadcast %cst_31 : f32 to vector<8x128xf32>
    %34 = arith.maximumf %32, %33 : vector<8x128xf32>
    %c0_32 = arith.constant 0 : index
    %c0_33 = arith.constant 0 : index
    %35 = vector.load %arg14[%c0_32, %c0_33] : memref<128x64xf32, #tpu.memory_space<vmem>>, vector<128x64xf32>
    %c0_34 = arith.constant 0 : index
    %c0_35 = arith.constant 0 : index
    %36 = vector.load %arg15[%c0_34, %c0_35] : memref<128x64xf32, #tpu.memory_space<vmem>>, vector<128x64xf32>
    %c0_36 = arith.constant 0 : index
    %c0_37 = arith.constant 0 : index
    %c0_38 = arith.constant 0 : index
    %37 = vector.load %arg18[%c0_36, %c0_37, %c0_38] : memref<1x128x64xf32, #tpu.memory_space<vmem>>, vector<1x128x64xf32>
    %38 = vector.shape_cast %37 : vector<1x128x64xf32> to vector<128x64xf32>
    %39 = arith.mulf %36, %38 : vector<128x64xf32>
    %40 = arith.addf %35, %39 : vector<128x64xf32>
    %c0_39 = arith.constant 0 : index
    %c0_40 = arith.constant 0 : index
    %41 = vector.load %arg16[%c0_39, %c0_40] : memref<1x64xf32, #tpu.memory_space<vmem>>, vector<1x64xf32>
    %c0_41 = arith.constant 0 : index
    %c0_42 = arith.constant 0 : index
    %42 = vector.load %arg17[%c0_41, %c0_42] : memref<1x64xf32, #tpu.memory_space<vmem>>, vector<1x64xf32>
    %c0_43 = arith.constant 0 : index
    %c0_44 = arith.constant 0 : index
    %c0_45 = arith.constant 0 : index
    %43 = vector.load %arg19[%c0_43, %c0_44, %c0_45] : memref<1x1x64xf32, #tpu.memory_space<vmem>>, vector<1x1x64xf32>
    %44 = vector.shape_cast %43 : vector<1x1x64xf32> to vector<1x64xf32>
    %45 = arith.mulf %42, %44 : vector<1x64xf32>
    %46 = arith.addf %41, %45 : vector<1x64xf32>
    %cst_46 = arith.constant dense<0.000000e+00> : vector<8x64xf32>
    %47 = tpu.matmul %34, %40, %cst_46 {dimension_numbers = #tpu.dot_dimension_numbers<[1], [0], [0], [1], [0, 0, 1, 1], [], []>} : vector<8x128xf32>, vector<128x64xf32>, vector<8x64xf32> -> vector<8x64xf32>
    %48 = vector.broadcast %46 : vector<1x64xf32> to vector<8x64xf32>
    %49 = arith.addf %47, %48 : vector<8x64xf32>
    %cst_47 = arith.constant 0.000000e+00 : f32
    %50 = vector.broadcast %cst_47 : f32 to vector<8x64xf32>
    %51 = arith.maximumf %49, %50 : vector<8x64xf32>
    %c0_48 = arith.constant 0 : index
    %c0_49 = arith.constant 0 : index
    %c0_50 = arith.constant 0 : index
    %52 = vector.load %arg20[%c0_48, %c0_49, %c0_50] : memref<1x8x64xf32, #tpu.memory_space<vmem>>, vector<1x8x64xf32>
    %53 = vector.shape_cast %52 : vector<1x8x64xf32> to vector<8x64xf32>
    %54 = vector.shape_cast %51 : vector<8x64xf32> to vector<1x8x64xf32>
    tpu.vector_store %arg20[%c0_48, %c0_49, %c0_50], %54 {strides = array<i32>} : memref<1x8x64xf32, #tpu.memory_space<vmem>>, vector<1x8x64xf32>,
    return
  }
  func.func @transform_0(%arg0: i32) -> (i32, i32) {
    %c0_i32 = arith.constant 0 : i32
    %c0_i32_0 = arith.constant 0 : i32
    %c0_i32_1 = arith.constant 0 : i32
    return %c0_i32, %c0_i32_0 : i32, i32
  }
  func.func @transform_1(%arg0: i32) -> (i32, i32) {
    %c0_i32 = arith.constant 0 : i32
    %c0_i32_0 = arith.constant 0 : i32
    %c0_i32_1 = arith.constant 0 : i32
    return %c0_i32, %c0_i32_0 : i32, i32
  }
  func.func @transform_2(%arg0: i32) -> (i32, i32) {
    %c0_i32 = arith.constant 0 : i32
    %c0_i32_0 = arith.constant 0 : i32
    %c0_i32_1 = arith.constant 0 : i32
    return %c0_i32, %c0_i32_0 : i32, i32
  }
  func.func @transform_3(%arg0: i32) -> (i32, i32) {
    %c0_i32 = arith.constant 0 : i32
    %c0_i32_0 = arith.constant 0 : i32
    %c0_i32_1 = arith.constant 0 : i32
    return %c0_i32, %c0_i32_0 : i32, i32
  }
  func.func @transform_4(%arg0: i32) -> (i32, i32) {
    %c0_i32 = arith.constant 0 : i32
    %c0_i32_0 = arith.constant 0 : i32
    %c0_i32_1 = arith.constant 0 : i32
    return %c0_i32, %c0_i32_0 : i32, i32
  }
  func.func @transform_5(%arg0: i32) -> (i32, i32, i32) {
    %c0_i32 = arith.constant 0 : i32
    %c0_i32_0 = arith.constant 0 : i32
    %c0_i32_1 = arith.constant 0 : i32
    return %arg0, %c0_i32, %c0_i32_0 : i32, i32, i32
  }
  func.func @transform_6(%arg0: i32) -> (i32, i32, i32) {
    %c0_i32 = arith.constant 0 : i32
    %c0_i32_0 = arith.constant 0 : i32
    %c0_i32_1 = arith.constant 0 : i32
    return %arg0, %c0_i32, %c0_i32_0 : i32, i32, i32
  }
  func.func @transform_7(%arg0: i32) -> (i32, i32) {
    %c0_i32 = arith.constant 0 : i32
    %c0_i32_0 = arith.constant 0 : i32
    %c0_i32_1 = arith.constant 0 : i32
    return %c0_i32, %c0_i32_0 : i32, i32
  }
  func.func @transform_8(%arg0: i32) -> (i32, i32) {
    %c0_i32 = arith.constant 0 : i32
    %c0_i32_0 = arith.constant 0 : i32
    %c0_i32_1 = arith.constant 0 : i32
    return %c0_i32, %c0_i32_0 : i32, i32
  }
  func.func @transform_9(%arg0: i32) -> (i32, i32) {
    %c0_i32 = arith.constant 0 : i32
    %c0_i32_0 = arith.constant 0 : i32
    %c0_i32_1 = arith.constant 0 : i32
    return %c0_i32, %c0_i32_0 : i32, i32
  }
  func.func @transform_10(%arg0: i32) -> (i32, i32) {
    %c0_i32 = arith.constant 0 : i32
    %c0_i32_0 = arith.constant 0 : i32
    %c0_i32_1 = arith.constant 0 : i32
    return %c0_i32, %c0_i32_0 : i32, i32
  }
  func.func @transform_11(%arg0: i32) -> (i32, i32, i32) {
    %c0_i32 = arith.constant 0 : i32
    %c0_i32_0 = arith.constant 0 : i32
    %c0_i32_1 = arith.constant 0 : i32
    return %arg0, %c0_i32, %c0_i32_0 : i32, i32, i32
  }
  func.func @transform_12(%arg0: i32) -> (i32, i32, i32) {
    %c0_i32 = arith.constant 0 : i32
    %c0_i32_0 = arith.constant 0 : i32
    %c0_i32_1 = arith.constant 0 : i32
    return %arg0, %c0_i32, %c0_i32_0 : i32, i32, i32
  }
  func.func @transform_13(%arg0: i32) -> (i32, i32) {
    %c0_i32 = arith.constant 0 : i32
    %c0_i32_0 = arith.constant 0 : i32
    %c0_i32_1 = arith.constant 0 : i32
    return %c0_i32, %c0_i32_0 : i32, i32
  }
  func.func @transform_14(%arg0: i32) -> (i32, i32) {
    %c0_i32 = arith.constant 0 : i32
    %c0_i32_0 = arith.constant 0 : i32
    %c0_i32_1 = arith.constant 0 : i32
    return %c0_i32, %c0_i32_0 : i32, i32
  }
  func.func @transform_15(%arg0: i32) -> (i32, i32) {
    %c0_i32 = arith.constant 0 : i32
    %c0_i32_0 = arith.constant 0 : i32
    %c0_i32_1 = arith.constant 0 : i32
    return %c0_i32, %c0_i32_0 : i32, i32
  }
  func.func @transform_16(%arg0: i32) -> (i32, i32) {
    %c0_i32 = arith.constant 0 : i32
    %c0_i32_0 = arith.constant 0 : i32
    %c0_i32_1 = arith.constant 0 : i32
    return %c0_i32, %c0_i32_0 : i32, i32
  }
  func.func @transform_17(%arg0: i32) -> (i32, i32, i32) {
    %c0_i32 = arith.constant 0 : i32
    %c0_i32_0 = arith.constant 0 : i32
    %c0_i32_1 = arith.constant 0 : i32
    return %arg0, %c0_i32, %c0_i32_0 : i32, i32, i32
  }
  func.func @transform_18(%arg0: i32) -> (i32, i32, i32) {
    %c0_i32 = arith.constant 0 : i32
    %c0_i32_0 = arith.constant 0 : i32
    %c0_i32_1 = arith.constant 0 : i32
    return %arg0, %c0_i32, %c0_i32_0 : i32, i32, i32
  }
  func.func @transform_19(%arg0: i32) -> (i32, i32, i32) {
    %c0_i32 = arith.constant 0 : i32
    %c0_i32_0 = arith.constant 0 : i32
    %c0_i32_1 = arith.constant 0 : i32
    return %arg0, %c0_i32, %c0_i32_0 : i32, i32, i32
  }
}

</mosaic_0001>

<bundles_post_ra>
// kernel: tpu_custom_call.1
= control target key start
LH: loop header
LB: loop body
LE: loop exit
PB: predicated region body
PF: predicated region fallthrough
CT: control target
= control target key end

     0   :  { %s2753_s0 = inlined_call_operand.vmem [shape: f32[8,32], index: 0, kind: input, shape index: {}]   ;;  %s2754_s1 = inlined_call_operand.vmem [shape: f32[32,256], index: 1, kind: input, shape index: {}]   ;;  %s2755_s2 = inlined_call_operand.vmem [shape: f32[32,256], index: 2, kind: input, shape index: {}]   ;;  %s2756_s3 = inlined_call_operand.hbm [shape: f32[1,256], index: 3, kind: input, shape index: {}]   ;;  %s2757_s4 = inlined_call_operand.hbm [shape: f32[1,256], index: 4, kind: input, shape index: {}]   ;;  %s2758_s5 = inlined_call_operand.vmem [shape: f32[4,32,256], index: 5, kind: input, shape index: {}]   ;;  %s2759_s6 = inlined_call_operand.vmem [shape: f32[4,1,256], index: 6, kind: input, shape index: {}]   ;;  %s2760_s7 = inlined_call_operand.vmem [shape: f32[256,128], index: 7, kind: input, shape index: {}]   ;;  %s2761_s8 = inlined_call_operand.vmem [shape: f32[256,128], index: 8, kind: input, shape index: {}]   ;;  %s2762_s9 = inlined_call_operand.hbm [shape: f32[1,128], index: 9, kind: input, shape index: {}]   ;;  %s2763_s10 = inlined_call_operand.hbm [shape: f32[1,128], index: 10, kind: input, shape index: {}]   ;;  %s2764_s11 = inlined_call_operand.hbm [shape: f32[4,256,128], index: 11, kind: input, shape index: {}]   ;;  %s2765_s12 = inlined_call_operand.hbm [shape: f32[4,1,128], index: 12, kind: input, shape index: {}]   ;;  %s2766_s13 = inlined_call_operand.vmem [shape: f32[128,64], index: 13, kind: input, shape index: {}]   ;;  %s2767_s14 = inlined_call_operand.vmem [shape: f32[128,64], index: 14, kind: input, shape index: {}]   ;;  %s2768_s15 = inlined_call_operand.hbm [shape: f32[1,64], index: 15, kind: input, shape index: {}]   ;;  %s2769_s16 = inlined_call_operand.hbm [shape: f32[1,64], index: 16, kind: input, shape index: {}]   ;;  %s2770_s17 = inlined_call_operand.vmem [shape: f32[4,128,64], index: 17, kind: input, shape index: {}]   ;;  %s2771_s18 = inlined_call_operand.hbm [shape: f32[4,1,64], index: 18, kind: input, shape index: {}]   ;;  %s2772_s19 = inlined_call_operand.hbm [shape: f32[4,8,64], index: 19, kind: output, shape index: {}]  }
   0x1   :  { %2786 = sst [smem:[#allocation31_spill]] %s2753_s0 }
   0x2   :  { %2787 = sst [smem:[#allocation32_spill]] %s2754_s1 }
   0x3   :  { %2788 = sst [smem:[#allocation33_spill]] %s2755_s2 }
   0x4   :  { %2789 = sst [smem:[#allocation34_spill]] %s2756_s3 }
   0x5   :  { %2790 = sst [smem:[#allocation35_spill]] %s2757_s4 }
   0x6   :  { %2791 = sst [smem:[#allocation36_spill]] %s2759_s6 }
   0x7   :  { %2792 = sst [smem:[#allocation37_spill]] %s2762_s9 }
   0x8   :  { %2793 = sst [smem:[#allocation38_spill]] %s2763_s10 }
   0x9   :  { %2794 = sst [smem:[#allocation39_spill]] %s2764_s11 }
   0xa   :  { %2795 = sst [smem:[#allocation40_spill]] %s2766_s13 }
   0xb   :  { %2796 = sst [smem:[#allocation41_spill]] %s2767_s14 }
   0xc   :  { %2797 = sst [smem:[#allocation42_spill]] %s2768_s15 }
   0xd   :  { %2798 = sst [smem:[#allocation43_spill]] %s2772_s19 }
   0xe   :  { %24 = vsyncpa [#allocation3], 0 }
   0xf   :  { %25 = vsyncpa [#allocation6], 0 }
  0x10   :  { %26 = vsyncpa [#allocation9], 0 }
  0x11   :  { %27 = vsyncpa [#allocation15], 0 }
  0x12   :  { %29 = vsyncpa [#allocation15 + $0x1], 0 }
  0x13   :  { %30 = vsyncpa [#allocation4], 0 }
  0x14   :  { %32 = vsyncpa [#allocation4 + $0x1], 0  ;;  %s2085_s0 = smov 0   ;;  %s2087_s30 = smov 0  }
  0x15   :  { %s2089_s20 = smov 0   ;;  %s2091_s21 = smov 0  }
  0x16 LB: > { %2799 = sst [smem:[#allocation25_spill]] %s1963_s0  ;;  %s2109_s24 = sadd.s32 4294967295, %s1975_s21   ;;  %s1975_s21 = sphi %s2091_s21, %s2840_s21   ;;  %s1971_s20 = sphi %s2089_s20, %s2845_s20   ;;  %s1967_s30 = sphi %s2087_s30, %s2844_s30   ;;  %s1963_s0 = sphi %s2085_s0, %s2843_s0  }
  0x17   : > { %2800 = sst [smem:[#allocation26_spill]] %s1971_s20  ;;  %p1462_p0 = scmp.ge.s32.totalorder %s1975_s21, 1 }
  0x18   : > { %s2801_s2 = sld [smem:[#allocation34_spill]]  ;;  %p2784_p1 = scmp.eq.s32.totalorder %s2109_s24, 0 }
  0x19   : > { %p498_p2 = scmp.lt.s32.totalorder %s1975_s21, 5  ;;  %s1977_s3 = smov [#allocation2]  }
  0x1a   : > { %s521_s26 = sshll.u32 %s1977_s3, 4  ;;  %s2803_s4 = sld [smem:[#allocation35_spill]]  ;;  %s522_s26 = int_to_ptr.vmem [resolvable:$true] %s521_s26 }
  0x1b   : > { %p2114_p3 = pnand %p1462_p0, %p498_p2  ;;  %s1978_s22 = smov [#allocation5]  }
  0x1c   : > { %s2805_s9 = sld [smem:[#allocation37_spill]]  ;;  %s1979_s6 = smov [#allocation7]  }
  0x1d   : > { %p1528_p4 = pneg %p2114_p3  ;;  %s2806_s10 = sld [smem:[#allocation38_spill]] }
  0x1e   : > { %s519_s23 = sshll.u32 %s2801_s2, 4  ;;  %s533_s2 = sshll.u32 %s1978_s22, 4  ;;  %s520_s23 = int_to_ptr.hbm [resolvable:$true] %s519_s23  ;;  %s534_s2 = int_to_ptr.vmem [resolvable:$true] %s533_s2 }
  0x1f   : > { %p2125_p5 = pnand %p1528_p4, %p2784_p1  ;;  %s551_s19 = sshll.u32 %s1979_s6, 4  ;;  %s552_s19 = int_to_ptr.vmem [resolvable:$true] %s551_s19 }
  0x20   : > { %s531_s29 = sshll.u32 %s2803_s4, 4  ;;  %s1461_s4 = sadd.s32 4294967294, %s1975_s21   ;;  %s532_s29 = int_to_ptr.hbm [resolvable:$true] %s531_s29 }
  0x21   : > { %1531 = dma.hbm_to_vmem [thread:$0]  (!%p2125_p5), %s520_s23, 32, %s522_s26, [#allocation3]  }
  0x22   : > { %s549_s27 = sshll.u32 %s2805_s9, 4  ;;  %s1980_s23 = smov [#allocation8]   ;;  %s550_s27 = int_to_ptr.hbm [resolvable:$true] %s549_s27 }
  0x23   : > { %1534 = dma.hbm_to_vmem [thread:$0]  (!%p2125_p5), %s532_s29, 32, %s534_s2, [#allocation6]  }
  0x24   : > { %s561_s22 = sshll.u32 %s2806_s10, 4  ;;  %s563_s26 = sshll.u32 %s1980_s23, 4  ;;  %s562_s22 = int_to_ptr.hbm [resolvable:$true] %s561_s22  ;;  %s564_s26 = int_to_ptr.vmem [resolvable:$true] %s563_s26 }
  0x25   : > { %1537 = dma.hbm_to_vmem [thread:$0]  (!%p2125_p5), %s550_s27, 16, %s552_s19, [#allocation6]  }
  0x26   : > { %1540 = dma.hbm_to_vmem [thread:$0]  (!%p2125_p5), %s562_s22, 16, %s564_s26, [#allocation9]  }
  0x27   : > { %s2145_s29 = sadd.s32 1, %s1975_s21   ;;  %s286_s2 = sadd.s32 1, %s1971_s20 }
  0x28   : > { %2807 = sst [smem:[#allocation27_spill]] %s2145_s29  ;;  %s283_s6 = ssub.s32 %s1975_s21, %s2145_s29 }
  0x29   : > { %p284_p6 = scmp.eq.s32.totalorder %s283_s6, 0  ;;  %p293_p7 = scmp.ne.s32.totalorder %s1971_s20, %s1967_s30 }
  0x2a   : > { %p294_p8 = scmp.eq.s32.totalorder %s1975_s21, 0  ;;  %p299_p9 = scmp.ne.s32.totalorder %s1967_s30, %s1963_s0 }
  0x2b   : > { %s2156_s3 = scalar_select %p284_p6, %s1971_s20, %s286_s2  }
  0x2c   : > { %p2158_p10 = por %p294_p8, %p293_p7  ;;  %p2164_p11 = por %p2784_p1, %p299_p9 }
  0x2d   : > { %2808 = sst [smem:[#allocation28_spill]] %s2156_s3  ;;  %p485_p12 = scmp.eq.s32.totalorder %s2109_s24, 3 }
  0x2e   : > { %p491_p13 = scmp.eq.s32.totalorder %s1461_s4, 3  ;;  %p1567_p0 = scmp.lt.s32.totalorder %s1975_s21, 4 }
  0x2f   : > { %s619_s22 = sand.u32 1, %s1975_s21   ;;  %p2171_p2 = por %p485_p12, %p293_p7 }
  0x30   : > { %p2175_p4 = por %p491_p13, %p299_p9  ;;  %s2180_s26 = sand.u32 1, %s1971_s20  }
  0x31   : > { %s2811_s19 = scalar_select %p2171_p2, 1, 0 }
  0x32   : > { %s2813_s23 = scalar_select %p2175_p4, 1, 0 }
  0x33   : > { %2812 = sst [smem:[#allocation29_spill]] %s2811_s19  ;;  %s1470_s6 = sshll.u32 %s2180_s26, 8 }
  0x34   : > { %2814 = sst [smem:[#allocation30_spill]] %s2813_s23  ;;  %s1493_s2 = sshll.u32 %s1975_s21, 8 }
  0x35   : > { %s2815_s11 = sld [smem:[#allocation39_spill]]  ;;  %s623_s29 = scalar_lea.vmem [#allocation10], %s1470_s6 }
  0x36   : > { %s631_s0 = sshll.u32 %s623_s29, 4  ;;  %p2191_p6 = pnand %p1567_p0, %p2158_p10  ;;  %s632_s0 = int_to_ptr.vmem [resolvable:$true] %s631_s0 }
  0x37   : > { %s2817_s15 = sld [smem:[#allocation42_spill]]  ;;  %s2198_s9 = scalar_lea.sflag [#allocation3], %s619_s22 }
  0x38   : > { %p1739_p8 = pneg %p2191_p6 }
  0x3b   : > { %s628_s3 = scalar_lea.hbm %s2815_s11, %s1493_s2  ;;  %s1742_s20 = scalar_lea.hbm %s2815_s11, 1024 }
  0x3c   : > { %s629_s4 = sshll.u32 %s628_s3, 4  ;;  %s630_s4 = int_to_ptr.hbm [resolvable:$true] %s629_s4 }
  0x3d   : > { %s579_s14 = sshll.u32 %s2817_s15, 4  ;;  %s1735_s10 = sshra.s32 %s630_s4, 4  ;;  %s580_s14 = int_to_ptr.hbm [resolvable:$true] %s579_s14  ;;  %s1736_s10 = int_to_ptr.hbm [resolvable:$true] %s1735_s10 }
  0x3e   : > { %s1737_s29 = scalar_lea.hbm %s1736_s10, 256  ;;  %p1743_p12 = scmp.lt.s32.totalorder %s1736_s10, %s2815_s11 }
  0x3f   : > { %p1738_p7 = scmp.ne.s32.totalorder %s1736_s10, %s1737_s29  ;;  %p1744_p13 = scmp.lt.s32.totalorder %s1742_s20, %s1737_s29 }
  0x41   : > { %p1740_p9 = pnand %p1739_p8, %p1738_p7  ;;  %p1745_p0 = por %p1744_p13, %p1743_p12 }
  0x43   : > { %p1741_p10 = pneg %p1740_p9 }
  0x45   : > { %p1746_p1 = pnand %p1745_p0, %p1741_p10 }
  0x47   : > { %1749 = shalt.err (!%p1746_p1)
}
  0x48   : > { %s1981_s22 = smov 128   ;;  %s1982_s2 = smov 8  }
  0x49   : > { %1550 = dma.hbm_to_vmem [thread:$0]  (!%p2191_p6), %s630_s4, 4096, %s632_s0, %s2198_s9, %s1981_s22, %s1981_s22, %s1982_s2  }
  0x4a   : > { %s591_s15 = sshll.u32 %s2769_s16, 4  ;;  %s1983_s23 = smov [#allocation12]   ;;  %s592_s15 = int_to_ptr.hbm [resolvable:$true] %s591_s15 }
  0x4b   : > { %s581_s10 = sshll.u32 %s1983_s23, 4  ;;  %s1984_s29 = smov [#allocation13]   ;;  %s582_s10 = int_to_ptr.vmem [resolvable:$true] %s581_s10 }
  0x4c   : > { %1543 = dma.hbm_to_vmem [thread:$0]  (!%p2125_p5), %s580_s14, 16, %s582_s10, [#allocation6]  }
  0x4d   : > { %s593_s20 = sshll.u32 %s1984_s29, 4  ;;  %s647_s13 = scalar_lea.hbm %s2765_s12, %s1975_s21  ;;  %s594_s20 = int_to_ptr.vmem [resolvable:$true] %s593_s20 }
  0x4e   : > { %1546 = dma.hbm_to_vmem [thread:$0]  (!%p2125_p5), %s592_s15, 16, %s594_s20, [#allocation9]  }
  0x4f   : > { %s649_s0 = sshll.u32 %s647_s13, 4  ;;  %s644_s4 = scalar_lea.vmem [#allocation11], %s2180_s26  ;;  %s650_s0 = int_to_ptr.hbm [resolvable:$true] %s649_s0 }
  0x50   : > { %s651_s22 = sshll.u32 %s644_s4, 4  ;;  %s1825_s2 = sshra.s32 %s650_s0, 4  ;;  %s652_s22 = int_to_ptr.vmem [resolvable:$true] %s651_s22  ;;  %s1826_s2 = int_to_ptr.hbm [resolvable:$true] %s1825_s2 }
  0x51   : > { %s1827_s3 = scalar_lea.hbm %s1826_s2, 1  ;;  %s1832_s11 = scalar_lea.hbm %s2765_s12, 4 }
  0x52   : > { %p1828_p1 = scmp.ne.s32.totalorder %s1826_s2, %s1827_s3  ;;  %p1833_p5 = scmp.lt.s32.totalorder %s1826_s2, %s2765_s12 }
  0x53   : > { %p1834_p10 = scmp.lt.s32.totalorder %s1832_s11, %s1827_s3 }
  0x54   : > { %p1830_p7 = pnand %p1828_p1, %p1739_p8 }
  0x55   : > { %p1835_p12 = por %p1834_p10, %p1833_p5 }
  0x56   : > { %p1831_p9 = pneg %p1830_p7 }
  0x58   : > { %p1836_p13 = pnand %p1835_p12, %p1831_p9 }
  0x5a   : > { %1839 = shalt.err (!%p1836_p13)
}
  0x5b   : > { %1553 = dma.hbm_to_vmem [thread:$0]  (!%p2191_p6), %s650_s0, 16, %s652_s22, %s2198_s9  }
  0x5c   : > { %s672_s10 = scalar_lea.hbm %s2771_s18, %s1975_s21  ;;  %s669_s29 = scalar_lea.vmem [#allocation14], %s2180_s26 }
  0x5d   : > { %s676_s20 = sshll.u32 %s669_s29, 4  ;;  %s674_s6 = sshll.u32 %s672_s10, 4  ;;  %s677_s20 = int_to_ptr.vmem [resolvable:$true] %s676_s20  ;;  %s675_s6 = int_to_ptr.hbm [resolvable:$true] %s674_s6 }
  0x5e   : > { %s667_s4 = scalar_lea.sflag [#allocation15], %s2180_s26  ;;  %s1855_s2 = sshra.s32 %s675_s6, 4  ;;  %s1856_s2 = int_to_ptr.hbm [resolvable:$true] %s1855_s2 }
  0x5f   : > { %s1857_s3 = scalar_lea.hbm %s1856_s2, 1  ;;  %s1862_s0 = scalar_lea.hbm %s2771_s18, 4 }
  0x60   : > { %p1858_p0 = scmp.ne.s32.totalorder %s1856_s2, %s1857_s3  ;;  %p1863_p9 = scmp.lt.s32.totalorder %s1856_s2, %s2771_s18 }
  0x61   : > { %p1864_p5 = scmp.lt.s32.totalorder %s1862_s0, %s1857_s3 }
  0x62   : > { %p1860_p1 = pnand %p1858_p0, %p1739_p8 }
  0x63   : > { %p1865_p10 = por %p1864_p5, %p1863_p9 }
  0x64   : > { %p1861_p7 = pneg %p1860_p1 }
  0x66   : > { %p1866_p12 = pnand %p1865_p10, %p1861_p7 }
  0x68   : > { %1869 = shalt.err (!%p1866_p12)
}
  0x69   : > { %1556 = dma.hbm_to_vmem [thread:$0]  (!%p2191_p6), %s675_s6, 16, %s677_s20, %s667_s4  }
  0x6a   : > { %685 = sbr.rel (%p2114_p3) target bundleno = 557 (0x22d), region = 96  ;;  %p2818_p8 = scmp.eq.s32.totalorder (!%p2114_p3), %s2109_s24, 0 }
  0x6f   : > { %1930 = dma.done.wait (%p2818_p8), [#allocation3], 32   ;;  %p2819_p13 = pmov %p2818_p8 }
  0x70   : > { %p2820_p0 = pmov %p2818_p8 }
  0x71   : > { %1932 = vsyncadd (%p2819_p13), [#allocation3], 4294967264 }
  0x72   : > { %1934 = dma.done.wait (%p2820_p0), [#allocation6], 48   ;;  %p2821_p1 = pmov %p2820_p0 }
  0x73   : > { %p2822_p7 = pmov %p2820_p0 }
  0x74   : > { %1936 = vsyncadd (%p2821_p1), [#allocation6], 4294967248 }
  0x75   : > { %1938 = dma.done.wait (%p2822_p7), [#allocation9], 16   ;;  %p2823_p6 = pmov %p2820_p0 }
  0x76   : > { %s707_s25 = sand.u32 1, %s2109_s24   ;;  %s2271_s19 = sand.u32 1, %s1967_s30  }
  0x77   : > { %1940 = vsyncadd (%p2823_p6), [#allocation9], 4294967280  ;;  %s1478_s26 = sshll.u32 %s2271_s19, 8  ;;  %s708_s11 = scalar_lea.sflag [#allocation3], %s707_s25 }
  0x78   : > { %s2274_s23 = scalar_lea.vmem [#allocation10], %s1478_s26 }
  0x79   : > { %1942 = dma.done.wait (%p2164_p11), %s708_s11, 4112  }
  0x7a   : > { %1944 = vsyncadd (%p2164_p11), %s708_s11, 4294963184  ;;  %s720_s1 = scalar_lea.vmem [#allocation11], %s2271_s19  ;;  %p2824_p3 = pmov %p2820_p0 }
  0x7b   : > { %p2825_p9 = pmov %p2820_p0 }
  0x7c   : > { %1946 = dma.done.wait (%p2824_p3), [#allocation6], 16  }
  0x7d   : > { %1948 = vsyncadd (%p2825_p9), [#allocation6], 4294967280  ;;  %p2826_p5 = pmov %p2820_p0 }
  0x7e   : > { %p2827_p10 = pmov %p2820_p0 }
  0x7f   : > { %1950 = dma.done.wait (%p2826_p5), [#allocation9], 16  }
  0x80   : > { %1952 = vsyncadd (%p2827_p10), [#allocation9], 4294967280  ;;  %s737_s13 = scalar_lea.sflag [#allocation15], %s2271_s19  ;;  %s739_s15 = scalar_lea.vmem [#allocation14], %s2271_s19 }
  0x81   : > { %1954 = dma.done.wait (%p2164_p11), %s737_s13, 16  }
  0x82   : > { %1956 = vsyncadd (%p2164_p11), %s737_s13, 4294967280  ;;  %p817_p12 = scmp.lt.s32.totalorder %s2109_s24, 3  ;;  %s2828_s14 = sld [smem:[#allocation32_spill]]  ;;  %v975_v34 = vld [vmem:[%s2761_s8 + $0x78] sm:$0xff]  ;;  %vm882_vm0 = vcmask 261120   ;;  %v1007_v38 = vld [vmem:[%s2274_s23 + $0x78] sm:$0xff] }
  0x83   : > { %s2829_s0 = sld [smem:[#allocation33_spill]]  ;;  %v943_v37 = vld [vmem:[%s2760_s7 + $0x78] sm:$0xff]  ;;  %v974_v39 = vld [vmem:[%s2761_s8 + $0x70] sm:$0xff]  ;;  %v1039_v40 = vmul.f32 %v1007_v38, %v975_v34  ;;  %v973_v43 = vld [vmem:[%s2761_s8 + $0x68] sm:$0xff]  ;;  %vm1246_vm1 = vcmask 523264  }
  0x84   : > { %s2297_s10 = scalar_select %p817_p12, %s2109_s24, 3  ;;  %v942_v41 = vld [vmem:[%s2760_s7 + $0x70] sm:$0xff]  ;;  %v1006_v42 = vld [vmem:[%s2274_s23 + $0x70] sm:$0xff]  ;;  %v941_v47 = vld [vmem:[%s2760_s7 + $0x68] sm:$0xff] }
  0x85   : > { %s2831_s3 = sld [smem:[#allocation31_spill]]  ;;  %v1038_v46 = vmul.f32 %v1006_v42, %v974_v39  ;;  %v1005_v48 = vld [vmem:[%s2274_s23 + $0x68] sm:$0xff]  ;;  %v972_v49 = vld [vmem:[%s2761_s8 + $0x60] sm:$0xff]  ;;  %v1071_v51 = vadd.f32 %v1039_v40, %v943_v37  ;;  %v1004_v53 = vld [vmem:[%s2274_s23 + $0x60] sm:$0xff] }
  0x86   : > { %s1494_s29 = sshll.u32 %s2297_s10, 6  ;;  %v1037_v52 = vmul.f32 %v1005_v48, %v973_v43  ;;  %v971_v54 = vld [vmem:[%s2761_s8 + $0x58] sm:$0xff]  ;;  %v940_v57 = vld [vmem:[%s2760_s7 + $0x60] sm:$0xff]  ;;  %v1036_v58 = vmul.f32 %v1004_v53, %v972_v49  ;;  %v954_v49 = vld [vmem:[%s2760_s7 + $0xd0] sm:$0xff]  ;;  %s1495_s25 = sshll.u32 %s2297_s10, 7 }
  0x87   : > { %s2303_s4 = scalar_lea.vmem %s2758_s5, %s1494_s29  ;;  %v1070_v56 = vadd.f32 %v1038_v46, %v942_v41  ;;  %v1003_v59 = vld [vmem:[%s2274_s23 + $0x58] sm:$0xff]  ;;  %v991_v60 = vld [vmem:[%s2761_s8 + $0xf8] sm:$0xff]  ;;  %1096 = vmatpush.msra.mxu2 %v1071_v51  ;;  %v966_v41 = vld [vmem:[%s2761_s8 + $0x30] sm:$0xff]  ;;  %s1484_s28 = sshll.u32 %s2297_s10, 1 }
  0x88   : > { %v838_v0 = vld [vmem:[%s2828_s14 + $0x30] sm:$0xff]  ;;  %v836_v4 = vld [vmem:[%s2828_s14 + $0x20] sm:$0xff]  ;;  %v855_v20 = vld [vmem:[%s2303_s4 + $0x38] sm:$0xff]  ;;  %v1069_v61 = vadd.f32 %v1037_v52, %v941_v47  ;;  %v1035_v62 = vmul.f32 %v1003_v59, %v971_v54  ;;  %s2834_s13 = sld [smem:[#allocation41_spill]] }
  0x89   : > { %s2830_s22 = smov %s2829_s0  ;;  %v846_v1 = vld [vmem:[%s2829_s0 + $0x30] sm:$0xff]  ;;  %v852_v6 = vld [vmem:[%s2303_s4 + $0x20] sm:$0xff]  ;;  %v839_v22 = vld [vmem:[%s2828_s14 + $0x38] sm:$0xff]  ;;  %1097 = vmatpush.msra.mxu2 %v1070_v56  ;;  %s2832_s0 = sld [smem:[#allocation40_spill]] }
  0x8a   : > { %v854_v2 = vld [vmem:[%s2303_s4 + $0x30] sm:$0xff]  ;;  %v844_v5 = vld [vmem:[%s2830_s22 + $0x20] sm:$0xff]  ;;  %v847_v18 = vld [vmem:[%s2830_s22 + $0x38] sm:$0xff] }
  0x8b   : > { %v862_v3 = vmul.f32 %v854_v2, %v846_v1  ;;  %v860_v7 = vmul.f32 %v852_v6, %v844_v5  ;;  %v834_v8 = vld [vmem:[%s2828_s14 + $0x10] sm:$0xff]  ;;  %v840_v13 = vld [vmem:[%s2830_s22] sm:$0xff]  ;;  %v845_v21 = vld [vmem:[%s2830_s22 + $0x28] sm:$0xff]  ;;  %v863_v23 = vmul.f32 %v855_v20, %v847_v18  ;;  %1098 = vmatpush.msra.mxu2 %v1069_v61 }
  0x8c   : > { %v842_v9 = vld [vmem:[%s2830_s22 + $0x10] sm:$0xff]  ;;  %v848_v14 = vld [vmem:[%s2303_s4] sm:$0xff]  ;;  %v853_v24 = vld [vmem:[%s2303_s4 + $0x28] sm:$0xff] }
  0x8d   : > { %v850_v10 = vld [vmem:[%s2303_s4 + $0x10] sm:$0xff]  ;;  %v870_v11 = vadd.f32 %v862_v3, %v838_v0  ;;  %v868_v15 = vadd.f32 %v860_v7, %v836_v4  ;;  %v832_v16 = vld [vmem:[%s2828_s14] sm:$0xff]  ;;  %v856_v17 = vmul.f32 %v848_v14, %v840_v13  ;;  %v843_v25 = vld [vmem:[%s2830_s22 + $0x18] sm:$0xff]  ;;  %v861_v29 = vmul.f32 %v853_v24, %v845_v21 }
  0x8e   : > { %v858_v12 = vmul.f32 %v850_v10, %v842_v9  ;;  %v2350_v27 = vld [vmem:[%s2831_s3] sm:$0xff]  ;;  %v837_v28 = vld [vmem:[%s2828_s14 + $0x28] sm:$0xff]  ;;  %v851_v30 = vld [vmem:[%s2303_s4 + $0x18] sm:$0xff]  ;;  %v871_v35 = vadd.f32 %v863_v23, %v839_v22  ;;  %v1068_v7 = vadd.f32 %v1036_v58, %v940_v57  ;;  %s2598_s3 = scalar_lea.vmem %s2770_s17, %s1495_s25 }
  0x8f   : > { %898 = vmatpush.msra.mxu1 %v870_v11  ;;  %v864_v26 = vadd.f32 %v856_v17, %v832_v16  ;;  %v835_v31 = vld [vmem:[%s2828_s14 + $0x18] sm:$0xff]  ;;  %v841_v32 = vld [vmem:[%s2830_s22 + $0x8] sm:$0xff]  ;;  %v859_v36 = vmul.f32 %v851_v30, %v843_v25  ;;  %v869_v44 = vadd.f32 %v861_v29, %v837_v28  ;;  %v1023_v0 = vld [vmem:[%s2274_s23 + $0xf8] sm:$0xff]  ;;  %s2833_s27 = smov %s2832_s0 }
  0x90   : > { %v866_v19 = vadd.f32 %v858_v12, %v834_v8  ;;  %v849_v33 = vld [vmem:[%s2303_s4 + $0x8] sm:$0xff]  ;;  %v959_v63 = vld [vmem:[%s2760_s7 + $0xf8] sm:$0xff]  ;;  %v970_v1 = vld [vmem:[%s2761_s8 + $0x50] sm:$0xff]  ;;  %v1055_v4 = vmul.f32 %v1023_v0, %v991_v60  ;;  %1099 = vmatpush.msra.mxu2 %v1068_v7  ;;  %s2835_s4 = sld [smem:[#allocation36_spill]] }
  0x91   : > { %899 = vmatpush.msra.mxu1 %v868_v15  ;;  %v857_v45 = vmul.f32 %v849_v33, %v841_v32  ;;  %v833_v50 = vld [vmem:[%s2828_s14 + $0x8] sm:$0xff]  ;;  %v867_v55 = vadd.f32 %v859_v36, %v835_v31  ;;  %v939_v3 = vld [vmem:[%s2760_s7 + $0x58] sm:$0xff]  ;;  %v990_v6 = vld [vmem:[%s2761_s8 + $0xf0] sm:$0xff] }
  0x92   : > { %v1002_v5 = vld [vmem:[%s2274_s23 + $0x50] sm:$0xff]  ;;  %v958_v9 = vld [vmem:[%s2760_s7 + $0xf0] sm:$0xff]  ;;  %v969_v11 = vld [vmem:[%s2761_s8 + $0x48] sm:$0xff]  ;;  %v1087_v12 = vadd.f32 %v1055_v4, %v959_v63  ;;  %v1067_v17 = vadd.f32 %v1035_v62, %v939_v3 }
  0x93   : > { %900 = vmatpush.msra.mxu1 %v866_v19  ;;  %v865_v2 = vadd.f32 %v857_v45, %v833_v50  ;;  %v1034_v8 = vmul.f32 %v1002_v5, %v970_v1  ;;  %v1022_v10 = vld [vmem:[%s2274_s23 + $0xf0] sm:$0xff]  ;;  %v938_v13 = vld [vmem:[%s2760_s7 + $0x50] sm:$0xff]  ;;  %v989_v16 = vld [vmem:[%s2761_s8 + $0xe8] sm:$0xff] }
  0x94   : > { %v1054_v14 = vmul.f32 %v1022_v10, %v990_v6  ;;  %v1001_v15 = vld [vmem:[%s2274_s23 + $0x48] sm:$0xff]  ;;  %v957_v19 = vld [vmem:[%s2760_s7 + $0xe8] sm:$0xff]  ;;  %v968_v21 = vld [vmem:[%s2761_s8 + $0x40] sm:$0xff]  ;;  %1116 = vmatpush.msra.mxu3 %v1087_v12  ;;  %1100 = vmatpush.msra.mxu2 %v1067_v17 }
  0x95   : > { %901 = vmatpush.msra.mxu1 %v864_v26  ;;  %v1033_v18 = vmul.f32 %v1001_v15, %v969_v11  ;;  %v1021_v20 = vld [vmem:[%s2274_s23 + $0xe8] sm:$0xff]  ;;  %v937_v23 = vld [vmem:[%s2760_s7 + $0x48] sm:$0xff]  ;;  %v988_v26 = vld [vmem:[%s2761_s8 + $0xe0] sm:$0xff]  ;;  %v1066_v28 = vadd.f32 %v1034_v8, %v938_v13 }
  0x96   : > { %1487 = vmatmul.msk.f32.vlgmr.msra.gmra.mxu1 %vm882_vm0, %v2350_v27  ;;  %v1086_v22 = vadd.f32 %v1054_v14, %v958_v9  ;;  %v1053_v24 = vmul.f32 %v1021_v20, %v989_v16  ;;  %v1000_v25 = vld [vmem:[%s2274_s23 + $0x40] sm:$0xff]  ;;  %v956_v30 = vld [vmem:[%s2760_s7 + $0xe0] sm:$0xff]  ;;  %v967_v32 = vld [vmem:[%s2761_s8 + $0x38] sm:$0xff] }
  0x97   : > { %918 = vmatpush.msrb.mxu1 %v871_v35  ;;  %v1032_v29 = vmul.f32 %v1000_v25, %v968_v21  ;;  %v1020_v31 = vld [vmem:[%s2274_s23 + $0xe0] sm:$0xff]  ;;  %v999_v35 = vld [vmem:[%s2274_s23 + $0x38] sm:$0xff]  ;;  %v987_v36 = vld [vmem:[%s2761_s8 + $0xd8] sm:$0xff]  ;;  %v1065_v37 = vadd.f32 %v1033_v18, %v937_v23  ;;  %1101 = vmatpush.msra.mxu2 %v1066_v28 }
  0x98   : > { %1117 = vmatpush.msra.mxu3 %v1086_v22  ;;  %v1085_v33 = vadd.f32 %v1053_v24, %v957_v19  ;;  %v1052_v34 = vmul.f32 %v1020_v31, %v988_v26  ;;  %v1031_v38 = vmul.f32 %v999_v35, %v967_v32  ;;  %v955_v39 = vld [vmem:[%s2760_s7 + $0xd8] sm:$0xff]  ;;  %v1019_v40 = vld [vmem:[%s2274_s23 + $0xd8] sm:$0xff]  ;;  %v986_v46 = vld [vmem:[%s2761_s8 + $0xd0] sm:$0xff] }
  0x99   : > { %919 = vmatpush.msrb.mxu1 %v869_v44  ;;  %v935_v43 = vld [vmem:[%s2760_s7 + $0x38] sm:$0xff]  ;;  %v1051_v44 = vmul.f32 %v1019_v40, %v987_v36  ;;  %v965_v51 = vld [vmem:[%s2761_s8 + $0x28] sm:$0xff]  ;;  %v934_v53 = vld [vmem:[%s2760_s7 + $0x30] sm:$0xff]  ;;  %1102 = vmatpush.msra.mxu2 %v1065_v37 }
  0x9a   : > { %1118 = vmatpush.msra.mxu3 %v1085_v33  ;;  %v1084_v42 = vadd.f32 %v1052_v34, %v956_v30  ;;  %v998_v45 = vld [vmem:[%s2274_s23 + $0x30] sm:$0xff]  ;;  %v985_v56 = vld [vmem:[%s2761_s8 + $0xc8] sm:$0xff]  ;;  %v1063_v57 = vadd.f32 %v1031_v38, %v935_v43  ;;  %v1017_v60 = vld [vmem:[%s2274_s23 + $0xc8] sm:$0xff] }
  0x9b   : > { %920 = vmatpush.msrb.mxu1 %v867_v55  ;;  %v1030_v48 = vmul.f32 %v998_v45, %v966_v41  ;;  %v1018_v50 = vld [vmem:[%s2274_s23 + $0xd0] sm:$0xff]  ;;  %v1083_v52 = vadd.f32 %v1051_v44, %v955_v39  ;;  %v997_v55 = vld [vmem:[%s2274_s23 + $0x28] sm:$0xff]  ;;  %v953_v59 = vld [vmem:[%s2760_s7 + $0xc8] sm:$0xff]  ;;  %v1049_v0 = vmul.f32 %v1017_v60, %v985_v56 }
  0x9c   : > { %1119 = vmatpush.msra.mxu3 %v1084_v42  ;;  %v1050_v54 = vmul.f32 %v1018_v50, %v986_v46  ;;  %v1029_v58 = vmul.f32 %v997_v55, %v965_v51  ;;  %v964_v61 = vld [vmem:[%s2761_s8 + $0x20] sm:$0xff]  ;;  %v933_v63 = vld [vmem:[%s2760_s7 + $0x28] sm:$0xff]  ;;  %v963_v7 = vld [vmem:[%s2761_s8 + $0x18] sm:$0xff] }
  0x9d   : > { %921 = vmatpush.msrb.mxu1 %v865_v2  ;;  %v996_v1 = vld [vmem:[%s2274_s23 + $0x20] sm:$0xff]  ;;  %v984_v2 = vld [vmem:[%s2761_s8 + $0xc0] sm:$0xff]  ;;  %v1062_v3 = vadd.f32 %v1030_v48, %v934_v53  ;;  %v1081_v8 = vadd.f32 %v1049_v0, %v953_v59  ;;  %v983_v12 = vld [vmem:[%s2761_s8 + $0xb8] sm:$0xff] }
  0x9e   : > { %1488 = vmatmul.msk.f32.vlgmr.msrb.gmra.mxu1 %vm882_vm0, %v2350_v27  ;;  %v936_v27 = vld [vmem:[%s2760_s7 + $0x40] sm:$0xff]  ;;  %1120 = vmatpush.msra.mxu3 %v1083_v52  ;;  %v1082_v62 = vadd.f32 %v1050_v54, %v954_v49  ;;  %v1028_v4 = vmul.f32 %v996_v1, %v964_v61  ;;  %v1016_v6 = vld [vmem:[%s2274_s23 + $0xc0] sm:$0xff]  ;;  %v1061_v13 = vadd.f32 %v1029_v58, %v933_v63  ;;  %v951_v15 = vld [vmem:[%s2760_s7 + $0xb8] sm:$0xff] }
  0x9f   : > { %v1064_v47 = vadd.f32 %v1032_v29, %v936_v27  ;;  %v952_v5 = vld [vmem:[%s2760_s7 + $0xc0] sm:$0xff]  ;;  %v1048_v10 = vmul.f32 %v1016_v6, %v984_v2  ;;  %v931_v18 = vld [vmem:[%s2760_s7 + $0x18] sm:$0xff]  ;;  %v962_v23 = vld [vmem:[%s2761_s8 + $0x10] sm:$0xff] }
  0xa0   : > { %1121 = vmatpush.msra.mxu3 %v1082_v62  ;;  %v932_v9 = vld [vmem:[%s2760_s7 + $0x20] sm:$0xff]  ;;  %v994_v24 = vld [vmem:[%s2274_s23 + $0x10] sm:$0xff]  ;;  %v982_v25 = vld [vmem:[%s2761_s8 + $0xb0] sm:$0xff] }
  0xa1   : > { %1103 = vmatpush.msra.mxu2 %v1064_v47  ;;  %v995_v11 = vld [vmem:[%s2274_s23 + $0x18] sm:$0xff]  ;;  %v1080_v17 = vadd.f32 %v1048_v10, %v952_v5  ;;  %v1060_v20 = vadd.f32 %v1028_v4, %v932_v9  ;;  %v1026_v26 = vmul.f32 %v994_v24, %v962_v23  ;;  %v1014_v28 = vld [vmem:[%s2274_s23 + $0xb0] sm:$0xff]  ;;  %v930_v29 = vld [vmem:[%s2760_s7 + $0x10] sm:$0xff] }
  0xa2   : > { %v1027_v14 = vmul.f32 %v995_v11, %v963_v7  ;;  %v1015_v16 = vld [vmem:[%s2274_s23 + $0xb8] sm:$0xff]  ;;  %1122 = vmatpush.msra.mxu3 %v1081_v8  ;;  %v950_v30 = vld [vmem:[%s2760_s7 + $0xb0] sm:$0xff]  ;;  %v1046_v31 = vmul.f32 %v1014_v28, %v982_v25  ;;  %v961_v32 = vld [vmem:[%s2761_s8 + $0x8] sm:$0xff] }
  0xa3   : > { %1104 = vmatpush.msra.mxu2 %v1063_v57  ;;  %v1047_v19 = vmul.f32 %v1015_v16, %v983_v12  ;;  %v1058_v33 = vadd.f32 %v1026_v26, %v930_v29  ;;  %v993_v27 = vld [vmem:[%s2274_s23 + $0x8] sm:$0xff]  ;;  %v981_v34 = vld [vmem:[%s2761_s8 + $0xa8] sm:$0xff]  ;;  %v960_v41 = vld [vmem:[%s2761_s8] sm:$0xff] }
  0xa4   : > { %1123 = vmatpush.msra.mxu3 %v1080_v17  ;;  %v1059_v22 = vadd.f32 %v1027_v14, %v931_v18  ;;  %v1013_v35 = vld [vmem:[%s2274_s23 + $0xa8] sm:$0xff]  ;;  %v1078_v36 = vadd.f32 %v1046_v31, %v950_v30  ;;  %v929_v37 = vld [vmem:[%s2760_s7 + $0x8] sm:$0xff]  ;;  %v1025_v38 = vmul.f32 %v993_v27, %v961_v32  ;;  %v980_v43 = vld [vmem:[%s2761_s8 + $0xa0] sm:$0xff] }
  0xa5   : > { %1105 = vmatpush.msra.mxu2 %v1062_v3  ;;  %v1079_v21 = vadd.f32 %v1047_v19, %v951_v15  ;;  %v949_v39 = vld [vmem:[%s2760_s7 + $0xa8] sm:$0xff]  ;;  %v1045_v40 = vmul.f32 %v1013_v35, %v981_v34  ;;  %v928_v47 = vld [vmem:[%s2760_s7] sm:$0xff]  ;;  %v979_v51 = vld [vmem:[%s2761_s8 + $0x98] sm:$0xff] }
  0xa6   : > { %v992_v42 = vld [vmem:[%s2274_s23] sm:$0xff]  ;;  %v1057_v45 = vadd.f32 %v1025_v38, %v929_v37  ;;  %v948_v49 = vld [vmem:[%s2760_s7 + $0xa0] sm:$0xff]  ;;  %v947_v55 = vld [vmem:[%s2760_s7 + $0x98] sm:$0xff] }
  0xa7   : > { %1106 = vmatpush.msra.mxu2 %v1061_v13  ;;  %1124 = vmatpush.msra.mxu3 %v1079_v21  ;;  %v1012_v44 = vld [vmem:[%s2274_s23 + $0xa0] sm:$0xff]  ;;  %v1077_v46 = vadd.f32 %v1045_v40, %v949_v39  ;;  %v1024_v48 = vmul.f32 %v992_v42, %v960_v41  ;;  %v1011_v52 = vld [vmem:[%s2274_s23 + $0x98] sm:$0xff]  ;;  %v978_v57 = vld [vmem:[%s2761_s8 + $0x90] sm:$0xff] }
  0xa8   : > { %v1044_v50 = vmul.f32 %v1012_v44, %v980_v43  ;;  %v1043_v56 = vmul.f32 %v1011_v52, %v979_v51  ;;  %v1010_v58 = vld [vmem:[%s2274_s23 + $0x90] sm:$0xff]  ;;  %v946_v61 = vld [vmem:[%s2760_s7 + $0x90] sm:$0xff]  ;;  %v977_v62 = vld [vmem:[%s2761_s8 + $0x88] sm:$0xff] }
  0xa9   : > { %1107 = vmatpush.msra.mxu2 %v1060_v20  ;;  %1125 = vmatpush.msra.mxu3 %v1078_v36  ;;  %v1056_v53 = vadd.f32 %v1024_v48, %v928_v47  ;;  %v1042_v59 = vmul.f32 %v1010_v58, %v978_v57  ;;  %v1009_v63 = vld [vmem:[%s2274_s23 + $0x88] sm:$0xff]  ;;  %v945_v2 = vld [vmem:[%s2760_s7 + $0x88] sm:$0xff]  ;;  %v976_v3 = vld [vmem:[%s2761_s8 + $0x80] sm:$0xff] }
  0xaa   : > { %v1076_v54 = vadd.f32 %v1044_v50, %v948_v49  ;;  %v1075_v60 = vadd.f32 %v1043_v56, %v947_v55  ;;  %v1041_v1 = vmul.f32 %v1009_v63, %v977_v62  ;;  %v1008_v4 = vld [vmem:[%s2274_s23 + $0x80] sm:$0xff]  ;;  %v944_v7 = vld [vmem:[%s2760_s7 + $0x80] sm:$0xff]  ;;  %v1152_v9 = vld [vmem:[%s2832_s0 + $0x78] sm:$0xff]  ;;  %s825_s23 = scalar_lea.vmem %s2835_s4, %s1484_s28  ;;  %s2836_s28 = sld [smem:[#allocation43_spill]] }
  0xab   : > { %1108 = vmatpush.msra.mxu2 %v1059_v22  ;;  %1126 = vmatpush.msra.mxu3 %v1077_v46  ;;  %v1074_v0 = vadd.f32 %v1042_v59, %v946_v61  ;;  %v1040_v6 = vmul.f32 %v1008_v4, %v976_v3  ;;  %v1168_v10 = vld [vmem:[%s2834_s13 + $0x78] sm:$0xff]  ;;  %v1151_v13 = vld [vmem:[%s2833_s27 + $0x70] sm:$0xff]  ;;  %v1150_v17 = vld [vmem:[%s2833_s27 + $0x68] sm:$0xff] }
  0xac   : > { %v1073_v5 = vadd.f32 %v1041_v1, %v945_v2  ;;  %v1184_v11 = vld [vmem:[%s2598_s3 + $0x78] sm:$0xff]  ;;  %v1167_v14 = vld [vmem:[%s2834_s13 + $0x70] sm:$0xff]  ;;  %v1166_v18 = vld [vmem:[%s2834_s13 + $0x68] sm:$0xff] }
  0xad   : > { %1109 = vmatpush.msra.mxu2 %v1058_v33  ;;  %1127 = vmatpush.msra.mxu3 %v1076_v54  ;;  %v1072_v8 = vadd.f32 %v1040_v6, %v944_v7  ;;  %v1200_v12 = vmul.f32 %v1184_v11, %v1168_v10  ;;  %v1183_v15 = vld [vmem:[%s2598_s3 + $0x70] sm:$0xff]  ;;  %v1182_v19 = vld [vmem:[%s2598_s3 + $0x68] sm:$0xff]  ;;  %v873_v20 = vld [vmem:[#allocation5] sm:$0x3] }
  0xae   : > { %v1199_v16 = vmul.f32 %v1183_v15, %v1167_v14  ;;  %v1198_v22 = vmul.f32 %v1182_v19, %v1166_v18  ;;  %v1165_v23 = vld [vmem:[%s2834_s13 + $0x60] sm:$0xff]  ;;  %v1164_v29 = vld [vmem:[%s2834_s13 + $0x58] sm:$0xff]  ;;  %v1163_v27 = vld [vmem:[%s2834_s13 + $0x50] sm:$0xff] }
  0xaf   : > { %1110 = vmatpush.msra.mxu2 %v1057_v45  ;;  %1128 = vmatpush.msra.mxu3 %v1075_v60  ;;  %v1216_v21 = vadd.f32 %v1200_v12, %v1152_v9  ;;  %v1181_v24 = vld [vmem:[%s2598_s3 + $0x60] sm:$0xff]  ;;  %v1180_v30 = vld [vmem:[%s2598_s3 + $0x58] sm:$0xff]  ;;  %v1179_v34 = vld [vmem:[%s2598_s3 + $0x50] sm:$0xff] }
  0xb0   : > { %v1215_v25 = vadd.f32 %v1199_v16, %v1151_v13  ;;  %v1149_v26 = vld [vmem:[%s2833_s27 + $0x60] sm:$0xff]  ;;  %v1197_v28 = vmul.f32 %v1181_v24, %v1165_v23  ;;  %v1214_v32 = vadd.f32 %v1198_v22, %v1150_v17  ;;  %v1196_v33 = vmul.f32 %v1180_v30, %v1164_v29  ;;  %v1148_v35 = vld [vmem:[%s2833_s27 + $0x58] sm:$0xff]  ;;  %v1162_v36 = vld [vmem:[%s2834_s13 + $0x48] sm:$0xff]  ;;  %s1905_s11 = scalar_lea.hbm %s2836_s28, 32 }
  0xb1   : > { %1111 = vmatpush.msra.mxu2 %v1056_v53  ;;  %1129 = vmatpush.msra.mxu3 %v1074_v0  ;;  %v874_v31 = vld [vmem:[%s825_s23] sm:$0x3]  ;;  %v1178_v37 = vld [vmem:[%s2598_s3 + $0x48] sm:$0xff]  ;;  %v1195_v39 = vmul.f32 %v1179_v34, %v1163_v27  ;;  %v1147_v41 = vld [vmem:[%s2833_s27 + $0x50] sm:$0xff] }
  0xb2   : > { %1225 = vmatpush.msra.mxu0 %v1216_v21  ;;  %v1213_v38 = vadd.f32 %v1197_v28, %v1149_v26  ;;  %v875_v40 = vmul.f32 %v874_v31, %v873_v20  ;;  %v1161_v42 = vld [vmem:[%s2834_s13 + $0x40] sm:$0xff]  ;;  %v1212_v45 = vadd.f32 %v1196_v33, %v1148_v35  ;;  %v1194_v46 = vmul.f32 %v1178_v37, %v1162_v36  ;;  %v1146_v47 = vld [vmem:[%s2833_s27 + $0x48] sm:$0xff]  ;;  %v1160_v48 = vld [vmem:[%s2834_s13 + $0x38] sm:$0xff] }
  0xb3   : > { %1130 = vmatpush.msra.mxu3 %v1073_v5  ;;  %v1177_v43 = vld [vmem:[%s2598_s3 + $0x40] sm:$0xff]  ;;  %v1176_v49 = vld [vmem:[%s2598_s3 + $0x38] sm:$0xff]  ;;  %v1211_v50 = vadd.f32 %v1195_v39, %v1147_v41  ;;  %v1159_v3 = vld [vmem:[%s2834_s13 + $0x30] sm:$0xff] }
  0xb4   : > { %1226 = vmatpush.msra.mxu0 %v1215_v25  ;;  %v872_v44 = vld [vmem:[#allocation2] sm:$0x3]  ;;  %v1193_v51 = vmul.f32 %v1177_v43, %v1161_v42  ;;  %v1210_v54 = vadd.f32 %v1194_v46, %v1146_v47  ;;  %v1192_v55 = vmul.f32 %v1176_v49, %v1160_v48  ;;  %v1144_v56 = vld [vmem:[%s2833_s27 + $0x38] sm:$0xff]  ;;  %v1175_v4 = vld [vmem:[%s2598_s3 + $0x30] sm:$0xff] }
  0xb5   : > { %1131 = vmatpush.msra.mxu3 %v1072_v8  ;;  %v876_v52 = vadd.f32 %v875_v40, %v872_v44  ;;  %v1145_v53 = vld [vmem:[%s2833_s27 + $0x40] sm:$0xff]  ;;  %v1191_v5 = vmul.f32 %v1175_v4, %v1159_v3  ;;  %v1143_v6 = vld [vmem:[%s2833_s27 + $0x30] sm:$0xff]  ;;  %v1158_v7 = vld [vmem:[%s2834_s13 + $0x28] sm:$0xff] }
  0xb6   : > { %1227 = vmatpush.msra.mxu0 %v1214_v32  ;;  %v1209_v57 = vadd.f32 %v1193_v51, %v1145_v53  ;;  %v1208_v59 = vadd.f32 %v1192_v55, %v1144_v56  ;;  %v1174_v8 = vld [vmem:[%s2598_s3 + $0x28] sm:$0xff]  ;;  %v1157_v12 = vld [vmem:[%s2834_s13 + $0x20] sm:$0xff]  ;;  %v1156_v17 = vld [vmem:[%s2834_s13 + $0x18] sm:$0xff] }
  0xb7   : > { %v878_v58 = vperm.slane %v876_v52, 0  ;;  %v879_v63 = vperm.slane %v876_v52, 1  ;;  %v1207_v9 = vadd.f32 %v1191_v5, %v1143_v6  ;;  %v1190_v10 = vmul.f32 %v1174_v8, %v1158_v7  ;;  %v1142_v11 = vld [vmem:[%s2833_s27 + $0x28] sm:$0xff]  ;;  %v1173_v13 = vld [vmem:[%s2598_s3 + $0x20] sm:$0xff]  ;;  %v1140_v19 = vld [vmem:[%s2833_s27 + $0x18] sm:$0xff] }
  0xb8   : > { %1228 = vmatpush.msra.mxu0 %v1213_v38  ;;  %v1189_v15 = vmul.f32 %v1173_v13, %v1157_v12  ;;  %v1141_v16 = vld [vmem:[%s2833_s27 + $0x20] sm:$0xff]  ;;  %v1172_v20 = vld [vmem:[%s2598_s3 + $0x18] sm:$0xff]  ;;  %v1155_v22 = vld [vmem:[%s2834_s13 + $0x10] sm:$0xff] }
  0xb9   : > { %v1206_v14 = vadd.f32 %v1190_v10, %v1142_v11  ;;  %v1188_v21 = vmul.f32 %v1172_v20, %v1156_v17  ;;  %v1171_v23 = vld [vmem:[%s2598_s3 + $0x10] sm:$0xff]  ;;  %v1154_v28 = vld [vmem:[%s2834_s13 + $0x8] sm:$0xff]  ;;  %v1153_v33 = vld [vmem:[%s2834_s13] sm:$0xff] }
  0xba   : > { %1229 = vmatpush.msra.mxu0 %v1212_v45  ;;  %v1205_v18 = vadd.f32 %v1189_v15, %v1141_v16  ;;  %v1187_v24 = vmul.f32 %v1171_v23, %v1155_v22  ;;  %v1139_v26 = vld [vmem:[%s2833_s27 + $0x10] sm:$0xff]  ;;  %v1170_v29 = vld [vmem:[%s2598_s3 + $0x8] sm:$0xff]  ;;  %v1169_v27 = vld [vmem:[%s2598_s3] sm:$0xff]  ;;  %s1490_s3 = sshll.u32 %s2109_s24, 3 }
  0xbb   : > { %v1204_v25 = vadd.f32 %v1188_v21, %v1140_v19  ;;  %v1186_v31 = vmul.f32 %v1170_v29, %v1154_v28  ;;  %v1138_v32 = vld [vmem:[%s2833_s27 + $0x8] sm:$0xff]  ;;  %v1185_v35 = vmul.f32 %v1169_v27, %v1153_v33  ;;  %v1137_v36 = vld [vmem:[%s2833_s27] sm:$0xff]  ;;  %s1259_s20 = scalar_lea.hbm %s2836_s28, %s1490_s3 }
  0xbc   : > { %1230 = vmatpush.msra.mxu0 %v1211_v50  ;;  %v1203_v30 = vadd.f32 %v1187_v24, %v1139_v26  ;;  %v1089_v38 = vld [vmem:[#allocation8] sm:$0x1]  ;;  %v1090_v39 = vld [vmem:[%s720_s1] sm:$0x1]  ;;  %v1088_v41 = vld [vmem:[#allocation7] sm:$0x1] }
  0xbd   : > { %v1202_v34 = vadd.f32 %v1186_v31, %v1138_v32  ;;  %v1201_v37 = vadd.f32 %v1185_v35, %v1137_v36  ;;  %v1091_v40 = vmul.f32 %v1090_v39, %v1089_v38  ;;  %v1218_v49 = vld [vmem:[#allocation13] sm:$0x1]  ;;  %v1219_v50 = vld [vmem:[%s739_s15] sm:$0x1]  ;;  %v1217_v52 = vld [vmem:[#allocation12] sm:$0x1] }
  0xbe   : > { %1231 = vmatpush.msra.mxu0 %v1210_v54  ;;  %v1220_v51 = vmul.f32 %v1219_v50, %v1218_v49  ;;  %s1481_s1 = sshll.u32 %s2271_s19, 3  ;;  %s1263_s4 = sshll.u32 %s1259_s20, 4  ;;  %s1264_s4 = int_to_ptr.hbm [resolvable:$true] %s1263_s4 }
  0xbf   : > { %v1092_v42 = vadd.f32 %v1091_v40, %v1088_v41  ;;  %s816_s10 = scalar_lea.vmem [#allocation16], %s1481_s1  ;;  %s1249_s15 = scalar_lea.sflag [#allocation4], %s2271_s19 }
  0xc0   : > { %1232 = vmatpush.msra.mxu0 %v1209_v57  ;;  %v1221_v53 = vadd.f32 %v1220_v51, %v1217_v52  ;;  %s1261_s2 = sshll.u32 %s816_s10, 4  ;;  %s1899_s9 = sshra.s32 %s1264_s4, 4  ;;  %s1262_s2 = int_to_ptr.vmem [resolvable:$true] %s1261_s2  ;;  %s1900_s9 = int_to_ptr.hbm [resolvable:$true] %s1899_s9 }
  0xc1   : > { %v1094_v43 = vperm.slane %v1092_v42, 0  ;;  %s1901_s24 = scalar_lea.hbm %s1900_s9, 8  ;;  %p1906_p0 = scmp.lt.s32.totalorder %s1900_s9, %s2836_s28 }
  0xc2   : > { %1233 = vmatpush.msra.mxu0 %v1208_v59  ;;  %v1223_v54 = vperm.slane %v1221_v53, 0  ;;  %p1902_p11 = scmp.ne.s32.totalorder %s1900_s9, %s1901_s24  ;;  %p1907_p1 = scmp.lt.s32.totalorder %s1905_s11, %s1901_s24 }
  0xc4   : > { %1234 = vmatpush.msra.mxu0 %v1207_v9  ;;  %p1903_p8 = pnand %p1902_p11, %p2171_p2  ;;  %p1908_p7 = por %p1907_p1, %p1906_p0 }
  0xc6   : > { %1235 = vmatpush.msra.mxu0 %v1206_v14  ;;  %p1904_p13 = pneg %p1903_p8 }
  0xc8   : > { %1236 = vmatpush.msra.mxu0 %v1205_v18  ;;  %p1909_p6 = pnand %p1908_p7, %p1904_p13 }
  0xca   : > { %1237 = vmatpush.msra.mxu0 %v1204_v25 }
  0xcc   : > { %1238 = vmatpush.msra.mxu0 %v1203_v30 }
  0xce   : > { %1239 = vmatpush.msra.mxu0 %v1202_v34 }
  0xd0   : > { %1240 = vmatpush.msra.mxu0 %v1201_v37 }
 0x113   : > { %v903_v60 = vpop.f32.mrf.mxu1 }
 0x114   : > { %v904_v61 = vadd.f32 %v903_v60, %v878_v58 }
 0x116   : > { %v926_v62 = vmax.f32 %v904_v61, 0.0 }
 0x118   : > { %1112 = vmatmul.f32.vlgmr.msra.gmra.mxu2 %v926_v62 }
 0x11b   : > { %v923_v0 = vpop.f32.mrf.mxu1 }
 0x11c   : > { %v924_v1 = vadd.f32 %v923_v0, %v879_v63 }
 0x11e   : > { %v927_v2 = vmax.f32 %v924_v1, 0.0 }
 0x120   : > { %1132 = vmatmul.f32.vlgmr.msra.gmra.mxu3 %v927_v2 }
 0x19b   : > { %v1113_v44 = vpop.f32.mrf.mxu2 }
 0x19c   : > { %v1114_v45 = vadd.f32 %v1113_v44, %v1094_v43 }
 0x1a3   : > { %v1133_v46 = vpop.f32.mrf.mxu3 }
 0x1a4   : > { %v1134_v47 = vadd.f32 %v1133_v46, %v1114_v45 }
 0x1a6   : > { %v1136_v48 = vmax.f32 %v1134_v47, 0.0 }
 0x1a8   : > { %1241 = vmatmul.f32.vlgmr.msra.gmra.mxu0 %v1136_v48 }
 0x225   : > { %v1242_v55 = vpop.f32.mrf.mxu0 }
 0x226   : > { %v1243_v56 = vadd.f32 %v1242_v55, %v1223_v54 }
 0x228   : > { %v1245_v57 = vmax.f32 %v1243_v56, 0.0 }
 0x22a   : > { %1247 = vst.msk [vmem:[%s816_s10] sm:$0xff] %vm1246_vm1, %v1245_v57 }
 0x22b   : > { %1912 = shalt.err (!%p1909_p6)
}
 0x22c   : > { %1526 = dma.vmem_to_hbm [thread:$0]  (%p2171_p2), %s1262_s2, 128, %s1264_s4, %s1249_s15  }
 0x22d PF: > { %s2838_s19 = sld [smem:[#allocation25_spill]]  ;;  %p1574_p3 = scmp.ge.s32.totalorder %s1975_s21, 2 }
 0x22f   : > { %p1558_p9 = pnand %p1574_p3, %p2175_p4 }
 0x231   : > { %p1559_p5 = pneg %p1558_p9 }
 0x233   : > { %s1275_s25 = sand.u32 1, %s2838_s19  }
 0x234   : > { %s1276_s29 = scalar_lea.sflag [#allocation4], %s1275_s25 }
 0x235   : > { %1958 = dma.done.wait (%p1559_p5), %s1276_s29, 128  }
 0x236   : > { %1960 = vsyncadd (%p1559_p5), %s1276_s29, 4294967168  ;;  %s2840_s21 = sld [smem:[#allocation27_spill]]  ;;  %s2843_s0 = smov %s1967_s30 }
 0x237   : > { %s2841_s20 = sld [smem:[#allocation26_spill]] }
 0x238   : > { %s2842_s10 = sld [smem:[#allocation28_spill]] }
 0x23c   : > { %p35_p10 = scmp.ge.s32.totalorder %s2840_s21, 6  }
 0x23d   : > { %s2844_s30 = smov %s2841_s20 }
 0x23e   : > { %s2845_s20 = smov %s2842_s10  ;;  %37 = sbr.rel (!%p35_p10) target bundleno = 22 (0x16), region = 197 }
 0x243   :  { %1282 = vsyncpa [#allocation3], 1 }
 0x244   :  { %1284 = vsyncpa [#allocation3 + $0x1], 1 }
 0x245   :  { %1285 = vsyncpa [#allocation6], 1 }
 0x246   :  { %1286 = vsyncpa [#allocation9], 1 }
 0x247   :  { %1287 = vsyncpa [#allocation15], 1 }
 0x248   :  { %1289 = vsyncpa [#allocation15 + $0x1], 1 }
 0x249   :  { %1290 = vsyncpa [#allocation4], 1 }
 0x24a   :  { %1292 = vsyncpa [#allocation4 + $0x1], 1 }

</bundles_post_ra>
